<compile_context>
chip_gen: v7x
topology: tpu7x:2x2x1
jax: 0.10.0
libtpu: 0.0.40
codegen_flags: <defaults>
</compile_context>

<pallas_src>
import functools

import jax
import jax.numpy as jnp
from jax.experimental import pallas as pl
from jax.experimental.pallas import tpu as pltpu

_LN_EPS = 1e-5


# ----------------------------- kernel ---------------------------------------


def _dpb_kernel(residual, pos_dim, num_heads,
                x_ref, vec_ref, w12_ref, w3b3_ref, out_ref):
    # Everything is feature-major / lane-dense: (features, n_block).
    x = x_ref[...].astype(jnp.float32)              # (2, n)
    vec = vec_ref[...].astype(jnp.float32)          # (pos_dim, 11)

    w0c0, w0c1 = vec[:, 0:1], vec[:, 1:2]           # pos_proj weight columns
    b0 = vec[:, 2:3]
    g1, be1, b1 = vec[:, 3:4], vec[:, 4:5], vec[:, 5:6]
    g2, be2, b2 = vec[:, 6:7], vec[:, 7:8], vec[:, 8:9]
    g3, be3 = vec[:, 9:10], vec[:, 10:11]

    w1 = w12_ref[0].astype(jnp.float32)             # (pos_dim, pos_dim)
    w2 = w12_ref[1].astype(jnp.float32)             # (pos_dim, pos_dim)
    w3 = w3b3_ref[:, :pos_dim].astype(jnp.float32)  # (num_heads, pos_dim)
    b3 = w3b3_ref[:, pos_dim:pos_dim + 1].astype(jnp.float32)  # (num_heads, 1)

    inv_f = 1.0 / float(pos_dim)

    def ln_relu(h, g, be):
        # One-pass LayerNorm over the feature (sublane) axis: both reductions
        # issue back-to-back into the XLU, single EUP rsqrt, ReLU fused.
        s1 = jnp.sum(h, axis=0, keepdims=True)                  # (1, n)
        s2 = jnp.sum(h * h, axis=0, keepdims=True)              # (1, n)
        mean = s1 * inv_f
        var = jnp.maximum(s2 * inv_f - mean * mean, 0.0)
        inv_std = jax.lax.rsqrt(var + _LN_EPS)
        return jnp.maximum((h - mean) * (inv_std * g) + be, 0.0)

    # pos_proj: Linear(2 -> pos_dim). K=2 contraction -> two VPU broadcast
    # FMAs; keeps the strictly-serial chain off an MXU round-trip.
    pos = w0c0 * x[0:1, :] + w0c1 * x[1:2, :] + b0              # (pos_dim, n)

    def block(h, g, be, w, b):
        a = ln_relu(h, g, be)
        return jnp.dot(w, a, preferred_element_type=jnp.float32) + b

    if residual:
        pos = pos + block(pos, g1, be1, w1, b1)
        pos = pos + block(pos, g2, be2, w2, b2)
        pos = block(pos, g3, be3, w3, b3)
    else:
        pos = block(pos, g1, be1, w1, b1)
        pos = block(pos, g2, be2, w2, b2)
        pos = block(pos, g3, be3, w3, b3)

    out_ref[...] = pos.astype(out_ref.dtype)


# ----------------------------- wrapper ---------------------------------------


def _pack_params(p):
    """Pack the 14 parameter tensors (PyTorch layout) into 3 arrays."""
    vec = jnp.stack([
        p["w0"][:, 0], p["w0"][:, 1], p["b0"],
        p["g1"], p["be1"], p["b1"],
        p["g2"], p["be2"], p["b2"],
        p["g3"], p["be3"],
    ], axis=1).astype(jnp.float32)                               # (pos_dim, 11)
    w12 = jnp.stack([p["w1"], p["w2"]], axis=0).astype(jnp.float32)
    w3b3 = jnp.concatenate([p["w3"], p["b3"][:, None]],
                           axis=1).astype(jnp.float32)           # (H, pos_dim+1)
    return vec, w12, w3b3


def dynamic_pos_bias(biases, params, *, residual, block_n=None):
    """biases: (N, 2) relative coords. Returns the bias table heads-first as
    (num_heads, N) f32 (the layout the attention consumer indexes into)."""
    n = biases.shape[0]
    pos_dim = params["w1"].shape[0]
    num_heads = params["w3"].shape[0]

    vec, w12, w3b3 = _pack_params(params)
    x_t = biases.T.astype(jnp.float32)                           # (2, N)

    # Only v7x (2 TCs) benefits from a parallel row grid; for small tables a
    # single lane-dense invocation is best on v5e/v6e (grid steps cost ~0.35us).
    if block_n is None and n >= 4096:
        block_n = 1024

    pad_to = block_n if block_n is not None else 128
    n_pad = ((n + pad_to - 1) // pad_to) * pad_to
    if n_pad != n:
        x_t = jnp.pad(x_t, ((0, 0), (0, n_pad - n)))             # lane-align N

    kernel = functools.partial(_dpb_kernel, residual, pos_dim, num_heads)
    out_shape = jax.ShapeDtypeStruct((num_heads, n_pad), jnp.float32)

    if block_n is None:
        out = pl.pallas_call(
            kernel,
            out_shape=out_shape,
            in_specs=[pl.BlockSpec(memory_space=pltpu.MemorySpace.VMEM)] * 4,
            out_specs=pl.BlockSpec(memory_space=pltpu.MemorySpace.VMEM),
        )(x_t, vec, w12, w3b3)
    else:
        grid = (n_pad // block_n,)
        out = pl.pallas_call(
            kernel,
            out_shape=out_shape,
            grid=grid,
            in_specs=[
                pl.BlockSpec((2, block_n), lambda i: (0, i)),
                pl.BlockSpec((pos_dim, 11), lambda i: (0, 0)),
                pl.BlockSpec((2, pos_dim, pos_dim), lambda i: (0, 0, 0)),
                pl.BlockSpec((num_heads, pos_dim + 1), lambda i: (0, 0)),
            ],
            out_specs=pl.BlockSpec((num_heads, block_n), lambda i: (0, i)),
            compiler_params=pltpu.CompilerParams(
                dimension_semantics=("parallel",)),
        )(x_t, vec, w12, w3b3)

    return out[:, :n] if n_pad != n else out


# ----------------------------- params / reference ----------------------------


def init_params(key, dim, num_heads):
    """PyTorch-layout parameters: weights (out, in), 1-D biases / LN params."""
    pos_dim = dim // 4

    def linear(k, fan_in, fan_out):
        kw, kb = jax.random.split(k)
        bound = 1.0 / jnp.sqrt(float(fan_in))
        w = jax.random.uniform(kw, (fan_out, fan_in), jnp.float32, -bound, bound)
        b = jax.random.uniform(kb, (fan_out,), jnp.float32, -bound, bound)
        return w, b

    k0, k1, k2, k3 = jax.random.split(key, 4)
    w0, b0 = linear(k0, 2, pos_dim)                  # pos_proj
    w1, b1 = linear(k1, pos_dim, pos_dim)            # pos1 linear
    w2, b2 = linear(k2, pos_dim, pos_dim)            # pos2 linear
    w3, b3 = linear(k3, pos_dim, num_heads)          # pos3 linear
    ones = jnp.ones((pos_dim,), jnp.float32)
    zeros = jnp.zeros((pos_dim,), jnp.float32)
    return {"w0": w0, "b0": b0,
            "g1": ones, "be1": zeros, "w1": w1, "b1": b1,
            "g2": ones, "be2": zeros, "w2": w2, "b2": b2,
            "g3": ones, "be3": zeros, "w3": w3, "b3": b3}


def reference(biases, p, *, residual):
    """Pure-JAX mirror of the PyTorch module (two-pass LN). Returns (N, H)."""
    def ln(x, g, b):
        mean = jnp.mean(x, axis=-1, keepdims=True)
        var = jnp.mean(jnp.square(x - mean), axis=-1, keepdims=True)
        return (x - mean) / jnp.sqrt(var + _LN_EPS) * g + b

    def blk(h, g, be, w, b):
        return jnp.maximum(ln(h, g, be), 0.0) @ w.T + b

    pos = biases @ p["w0"].T + p["b0"]
    if residual:
        pos = pos + blk(pos, p["g1"], p["be1"], p["w1"], p["b1"])
        pos = pos + blk(pos, p["g2"], p["be2"], p["w2"], p["b2"])
        pos = blk(pos, p["g3"], p["be3"], p["w3"], p["b3"])
    else:
        pos = blk(pos, p["g1"], p["be1"], p["w1"], p["b1"])
        pos = blk(pos, p["g2"], p["be2"], p["w2"], p["b2"])
        pos = blk(pos, p["g3"], p["be3"], p["w3"], p["b3"])
    return pos


# ----------------------------- main -------------------------------------------


if __name__ == "__main__":
    dim, num_heads = 32, 4                # pos_dim = dim // 4 = 8
    params = init_params(jax.random.PRNGKey(0), dim, num_heads)

    ok = True
    # (group_size, block_n): group 4 -> N=49 single-shot; group 7 -> N=169 with
    # a forced row grid to exercise the parallel (v7x-style) path as well.
    for group_size, block_n in ((4, None), (7, 128)):
        rel = jnp.arange(1 - group_size, group_size, dtype=jnp.float32)
        biases = jnp.stack(jnp.meshgrid(rel, rel, indexing="ij"),
                           axis=-1).reshape(-1, 2)                 # ((2G-1)^2, 2)
        for residual in (True, False):
            out = dynamic_pos_bias(biases, params, residual=residual,
                                   block_n=block_n)
            out = jax.block_until_ready(out)
            assert out.shape == (num_heads, biases.shape[0])
            ref = reference(biases, params, residual=residual).T   # heads-first
            ok &= bool(jnp.allclose(out, ref, atol=1e-4, rtol=1e-4))

    print("KERNEL_OK" if ok else "KERNEL_MISMATCH")
</pallas_src>

<mosaic_0001>
module attributes {stable_mosaic.version = 11 : i64} {
  func.func @_dpb_kernel(%arg0: memref<2x128xf32, #tpu.memory_space<vmem>>, %arg1: memref<8x11xf32, #tpu.memory_space<vmem>>, %arg2: memref<2x8x8xf32, #tpu.memory_space<vmem>>, %arg3: memref<4x9xf32, #tpu.memory_space<vmem>>, %arg4: memref<4x128xf32, #tpu.memory_space<vmem>>) attributes {dimension_semantics = [], scalar_prefetch = 0 : i64, scratch_operands = 0 : i64, tpu.core_type = #tpu.core_type<tc>} {
    %c0 = arith.constant 0 : index
    %c0_0 = arith.constant 0 : index
    %0 = vector.load %arg0[%c0, %c0_0] : memref<2x128xf32, #tpu.memory_space<vmem>>, vector<2x128xf32>
    %c0_1 = arith.constant 0 : index
    %c0_2 = arith.constant 0 : index
    %1 = vector.load %arg1[%c0_1, %c0_2] : memref<8x11xf32, #tpu.memory_space<vmem>>, vector<8x11xf32>
    %2 = vector.extract_strided_slice %1 {offsets = [0, 0], sizes = [8, 1], strides = [1, 1]} : vector<8x11xf32> to vector<8x1xf32>
    %3 = vector.extract_strided_slice %1 {offsets = [0, 1], sizes = [8, 1], strides = [1, 1]} : vector<8x11xf32> to vector<8x1xf32>
    %4 = vector.extract_strided_slice %1 {offsets = [0, 2], sizes = [8, 1], strides = [1, 1]} : vector<8x11xf32> to vector<8x1xf32>
    %5 = vector.extract_strided_slice %1 {offsets = [0, 3], sizes = [8, 1], strides = [1, 1]} : vector<8x11xf32> to vector<8x1xf32>
    %6 = vector.extract_strided_slice %1 {offsets = [0, 4], sizes = [8, 1], strides = [1, 1]} : vector<8x11xf32> to vector<8x1xf32>
    %7 = vector.extract_strided_slice %1 {offsets = [0, 5], sizes = [8, 1], strides = [1, 1]} : vector<8x11xf32> to vector<8x1xf32>
    %8 = vector.extract_strided_slice %1 {offsets = [0, 6], sizes = [8, 1], strides = [1, 1]} : vector<8x11xf32> to vector<8x1xf32>
    %9 = vector.extract_strided_slice %1 {offsets = [0, 7], sizes = [8, 1], strides = [1, 1]} : vector<8x11xf32> to vector<8x1xf32>
    %10 = vector.extract_strided_slice %1 {offsets = [0, 8], sizes = [8, 1], strides = [1, 1]} : vector<8x11xf32> to vector<8x1xf32>
    %11 = vector.extract_strided_slice %1 {offsets = [0, 9], sizes = [8, 1], strides = [1, 1]} : vector<8x11xf32> to vector<8x1xf32>
    %12 = vector.extract_strided_slice %1 {offsets = [0, 10], sizes = [8, 1], strides = [1, 1]} : vector<8x11xf32> to vector<8x1xf32>
    %c0_3 = arith.constant 0 : index
    %c0_4 = arith.constant 0 : index
    %c0_5 = arith.constant 0 : index
    %13 = vector.load %arg2[%c0_3, %c0_4, %c0_5] : memref<2x8x8xf32, #tpu.memory_space<vmem>>, vector<1x8x8xf32>
    %14 = vector.shape_cast %13 : vector<1x8x8xf32> to vector<8x8xf32>
    %c1 = arith.constant 1 : index
    %c0_6 = arith.constant 0 : index
    %c0_7 = arith.constant 0 : index
    %15 = vector.load %arg2[%c1, %c0_6, %c0_7] : memref<2x8x8xf32, #tpu.memory_space<vmem>>, vector<1x8x8xf32>
    %16 = vector.shape_cast %15 : vector<1x8x8xf32> to vector<8x8xf32>
    %c0_8 = arith.constant 0 : index
    %c0_9 = arith.constant 0 : index
    %17 = vector.load %arg3[%c0_8, %c0_9] : memref<4x9xf32, #tpu.memory_space<vmem>>, vector<4x8xf32>
    %c0_10 = arith.constant 0 : index
    %c8 = arith.constant 8 : index
    %18 = vector.load %arg3[%c0_10, %c8] : memref<4x9xf32, #tpu.memory_space<vmem>>, vector<4x1xf32>
    %19 = vector.extract_strided_slice %0 {offsets = [0, 0], sizes = [1, 128], strides = [1, 1]} : vector<2x128xf32> to vector<1x128xf32>
    %20 = vector.broadcast %2 : vector<8x1xf32> to vector<8x128xf32>
    %21 = vector.broadcast %19 : vector<1x128xf32> to vector<8x128xf32>
    %22 = arith.mulf %20, %21 : vector<8x128xf32>
    %23 = vector.extract_strided_slice %0 {offsets = [1, 0], sizes = [1, 128], strides = [1, 1]} : vector<2x128xf32> to vector<1x128xf32>
    %24 = vector.broadcast %3 : vector<8x1xf32> to vector<8x128xf32>
    %25 = vector.broadcast %23 : vector<1x128xf32> to vector<8x128xf32>
    %26 = arith.mulf %24, %25 : vector<8x128xf32>
    %27 = arith.addf %22, %26 : vector<8x128xf32>
    %28 = vector.broadcast %4 : vector<8x1xf32> to vector<8x128xf32>
    %29 = arith.addf %27, %28 : vector<8x128xf32>
    %cst = arith.constant dense<0.000000e+00> : vector<128xf32>
    %30 = vector.multi_reduction <add>, %29, %cst [0] : vector<8x128xf32> to vector<128xf32>
    %31 = vector.shape_cast %30 : vector<128xf32> to vector<1x128xf32>
    %32 = arith.mulf %29, %29 : vector<8x128xf32>
    %cst_11 = arith.constant dense<0.000000e+00> : vector<128xf32>
    %33 = vector.multi_reduction <add>, %32, %cst_11 [0] : vector<8x128xf32> to vector<128xf32>
    %34 = vector.shape_cast %33 : vector<128xf32> to vector<1x128xf32>
    %cst_12 = arith.constant 1.250000e-01 : f32
    %35 = vector.broadcast %cst_12 : f32 to vector<1x128xf32>
    %36 = arith.mulf %31, %35 : vector<1x128xf32>
    %cst_13 = arith.constant 1.250000e-01 : f32
    %37 = vector.broadcast %cst_13 : f32 to vector<1x128xf32>
    %38 = arith.mulf %34, %37 : vector<1x128xf32>
    %39 = arith.mulf %36, %36 : vector<1x128xf32>
    %40 = arith.subf %38, %39 : vector<1x128xf32>
    %cst_14 = arith.constant 0.000000e+00 : f32
    %41 = vector.broadcast %cst_14 : f32 to vector<1x128xf32>
    %42 = arith.maximumf %40, %41 : vector<1x128xf32>
    %cst_15 = arith.constant 9.99999974E-6 : f32
    %43 = vector.broadcast %cst_15 : f32 to vector<1x128xf32>
    %44 = arith.addf %42, %43 : vector<1x128xf32>
    %45 = math.rsqrt %44 : vector<1x128xf32>
    %46 = vector.broadcast %36 : vector<1x128xf32> to vector<8x128xf32>
    %47 = arith.subf %29, %46 : vector<8x128xf32>
    %48 = vector.broadcast %45 : vector<1x128xf32> to vector<8x128xf32>
    %49 = vector.broadcast %5 : vector<8x1xf32> to vector<8x128xf32>
    %50 = arith.mulf %48, %49 : vector<8x128xf32>
    %51 = arith.mulf %47, %50 : vector<8x128xf32>
    %52 = vector.broadcast %6 : vector<8x1xf32> to vector<8x128xf32>
    %53 = arith.addf %51, %52 : vector<8x128xf32>
    %cst_16 = arith.constant 0.000000e+00 : f32
    %54 = vector.broadcast %cst_16 : f32 to vector<8x128xf32>
    %55 = arith.maximumf %53, %54 : vector<8x128xf32>
    %cst_17 = arith.constant dense<0.000000e+00> : vector<8x128xf32>
    %56 = tpu.matmul %14, %55, %cst_17 {dimension_numbers = #tpu.dot_dimension_numbers<[1], [0], [0], [1], [0, 0, 1, 1], [], []>} : vector<8x8xf32>, vector<8x128xf32>, vector<8x128xf32> -> vector<8x128xf32>
    %57 = vector.broadcast %7 : vector<8x1xf32> to vector<8x128xf32>
    %58 = arith.addf %56, %57 : vector<8x128xf32>
    %59 = arith.addf %29, %58 : vector<8x128xf32>
    %cst_18 = arith.constant dense<0.000000e+00> : vector<128xf32>
    %60 = vector.multi_reduction <add>, %59, %cst_18 [0] : vector<8x128xf32> to vector<128xf32>
    %61 = vector.shape_cast %60 : vector<128xf32> to vector<1x128xf32>
    %62 = arith.mulf %59, %59 : vector<8x128xf32>
    %cst_19 = arith.constant dense<0.000000e+00> : vector<128xf32>
    %63 = vector.multi_reduction <add>, %62, %cst_19 [0] : vector<8x128xf32> to vector<128xf32>
    %64 = vector.shape_cast %63 : vector<128xf32> to vector<1x128xf32>
    %cst_20 = arith.constant 1.250000e-01 : f32
    %65 = vector.broadcast %cst_20 : f32 to vector<1x128xf32>
    %66 = arith.mulf %61, %65 : vector<1x128xf32>
    %cst_21 = arith.constant 1.250000e-01 : f32
    %67 = vector.broadcast %cst_21 : f32 to vector<1x128xf32>
    %68 = arith.mulf %64, %67 : vector<1x128xf32>
    %69 = arith.mulf %66, %66 : vector<1x128xf32>
    %70 = arith.subf %68, %69 : vector<1x128xf32>
    %cst_22 = arith.constant 0.000000e+00 : f32
    %71 = vector.broadcast %cst_22 : f32 to vector<1x128xf32>
    %72 = arith.maximumf %70, %71 : vector<1x128xf32>
    %cst_23 = arith.constant 9.99999974E-6 : f32
    %73 = vector.broadcast %cst_23 : f32 to vector<1x128xf32>
    %74 = arith.addf %72, %73 : vector<1x128xf32>
    %75 = math.rsqrt %74 : vector<1x128xf32>
    %76 = vector.broadcast %66 : vector<1x128xf32> to vector<8x128xf32>
    %77 = arith.subf %59, %76 : vector<8x128xf32>
    %78 = vector.broadcast %75 : vector<1x128xf32> to vector<8x128xf32>
    %79 = vector.broadcast %8 : vector<8x1xf32> to vector<8x128xf32>
    %80 = arith.mulf %78, %79 : vector<8x128xf32>
    %81 = arith.mulf %77, %80 : vector<8x128xf32>
    %82 = vector.broadcast %9 : vector<8x1xf32> to vector<8x128xf32>
    %83 = arith.addf %81, %82 : vector<8x128xf32>
    %cst_24 = arith.constant 0.000000e+00 : f32
    %84 = vector.broadcast %cst_24 : f32 to vector<8x128xf32>
    %85 = arith.maximumf %83, %84 : vector<8x128xf32>
    %cst_25 = arith.constant dense<0.000000e+00> : vector<8x128xf32>
    %86 = tpu.matmul %16, %85, %cst_25 {dimension_numbers = #tpu.dot_dimension_numbers<[1], [0], [0], [1], [0, 0, 1, 1], [], []>} : vector<8x8xf32>, vector<8x128xf32>, vector<8x128xf32> -> vector<8x128xf32>
    %87 = vector.broadcast %10 : vector<8x1xf32> to vector<8x128xf32>
    %88 = arith.addf %86, %87 : vector<8x128xf32>
    %89 = arith.addf %59, %88 : vector<8x128xf32>
    %cst_26 = arith.constant dense<0.000000e+00> : vector<128xf32>
    %90 = vector.multi_reduction <add>, %89, %cst_26 [0] : vector<8x128xf32> to vector<128xf32>
    %91 = vector.shape_cast %90 : vector<128xf32> to vector<1x128xf32>
    %92 = arith.mulf %89, %89 : vector<8x128xf32>
    %cst_27 = arith.constant dense<0.000000e+00> : vector<128xf32>
    %93 = vector.multi_reduction <add>, %92, %cst_27 [0] : vector<8x128xf32> to vector<128xf32>
    %94 = vector.shape_cast %93 : vector<128xf32> to vector<1x128xf32>
    %cst_28 = arith.constant 1.250000e-01 : f32
    %95 = vector.broadcast %cst_28 : f32 to vector<1x128xf32>
    %96 = arith.mulf %91, %95 : vector<1x128xf32>
    %cst_29 = arith.constant 1.250000e-01 : f32
    %97 = vector.broadcast %cst_29 : f32 to vector<1x128xf32>
    %98 = arith.mulf %94, %97 : vector<1x128xf32>
    %99 = arith.mulf %96, %96 : vector<1x128xf32>
    %100 = arith.subf %98, %99 : vector<1x128xf32>
    %cst_30 = arith.constant 0.000000e+00 : f32
    %101 = vector.broadcast %cst_30 : f32 to vector<1x128xf32>
    %102 = arith.maximumf %100, %101 : vector<1x128xf32>
    %cst_31 = arith.constant 9.99999974E-6 : f32
    %103 = vector.broadcast %cst_31 : f32 to vector<1x128xf32>
    %104 = arith.addf %102, %103 : vector<1x128xf32>
    %105 = math.rsqrt %104 : vector<1x128xf32>
    %106 = vector.broadcast %96 : vector<1x128xf32> to vector<8x128xf32>
    %107 = arith.subf %89, %106 : vector<8x128xf32>
    %108 = vector.broadcast %105 : vector<1x128xf32> to vector<8x128xf32>
    %109 = vector.broadcast %11 : vector<8x1xf32> to vector<8x128xf32>
    %110 = arith.mulf %108, %109 : vector<8x128xf32>
    %111 = arith.mulf %107, %110 : vector<8x128xf32>
    %112 = vector.broadcast %12 : vector<8x1xf32> to vector<8x128xf32>
    %113 = arith.addf %111, %112 : vector<8x128xf32>
    %cst_32 = arith.constant 0.000000e+00 : f32
    %114 = vector.broadcast %cst_32 : f32 to vector<8x128xf32>
    %115 = arith.maximumf %113, %114 : vector<8x128xf32>
    %cst_33 = arith.constant dense<0.000000e+00> : vector<4x128xf32>
    %116 = tpu.matmul %17, %115, %cst_33 {dimension_numbers = #tpu.dot_dimension_numbers<[1], [0], [0], [1], [0, 0, 1, 1], [], []>} : vector<4x8xf32>, vector<8x128xf32>, vector<4x128xf32> -> vector<4x128xf32>
    %117 = vector.broadcast %18 : vector<4x1xf32> to vector<4x128xf32>
    %118 = arith.addf %116, %117 : vector<4x128xf32>
    %c0_34 = arith.constant 0 : index
    %c0_35 = arith.constant 0 : index
    %119 = vector.load %arg4[%c0_34, %c0_35] : memref<4x128xf32, #tpu.memory_space<vmem>>, vector<4x128xf32>
    tpu.vector_store %arg4[%c0_34, %c0_35], %118 {strides = array<i32>} : memref<4x128xf32, #tpu.memory_space<vmem>>, vector<4x128xf32>,
    return
  }
}

</mosaic_0001>

<bundles_post_ra>
// kernel: tpu_custom_call.1
= control target key start
LH: loop header
LB: loop body
LE: loop exit
PB: predicated region body
PF: predicated region fallthrough
CT: control target
= control target key end

     0   :  { %9 = vsyncpa [#allocation3], 0  ;;  %s708_s0 = inlined_call_operand.hbm [shape: f32[2,128], index: 0, kind: input, shape index: {}]   ;;  %s709_s1 = inlined_call_operand.hbm [shape: f32[8,11], index: 1, kind: input, shape index: {}]   ;;  %s710_s2 = inlined_call_operand.hbm [shape: f32[2,8,8], index: 2, kind: input, shape index: {}]   ;;  %s711_s3 = inlined_call_operand.vmem [shape: f32[4,9], index: 3, kind: input, shape index: {}]   ;;  %s712_s4 = inlined_call_operand.hbm [shape: f32[4,128], index: 4, kind: output, shape index: {}]  }
   0x1   :  { %10 = vsyncpa [#allocation6], 0 }
   0x2   :  { %11 = vsyncpa [#allocation4], 0  ;;  %s590_s15 = smov [#allocation5]   ;;  %s591_s17 = smov [#allocation2]  }
   0x3   :  { %s28_s16 = sshll.u32 %s590_s15, 4  ;;  %s18_s18 = sshll.u32 %s591_s17, 4  ;;  %s29_s16 = int_to_ptr.vmem [resolvable:$true] %s28_s16  ;;  %s19_s18 = int_to_ptr.vmem [resolvable:$true] %s18_s18 }
   0x4   :  { %s496_s21 = scalar_lea.hbm %s709_s1, 128 }
   0x5   :  { %p497_p0 = scmp.ne.s32.totalorder %s709_s1, %s496_s21  ;;  %p500_p1 = scmp.lt.u32.totalorder %s496_s21, %s709_s1 }
   0x7   :  { %p502_p2 = pnand %p500_p1, %p497_p0 }
   0x9   :  { %505 = shalt.err (!%p502_p2)
}
   0xa   :  { %s506_s26 = scalar_lea.vmem %s29_s16, 128  ;;  %p511_p4 = scmp.lt.s32.totalorder %s29_s16, %s29_s16 }
   0xb   :  { %p507_p3 = scmp.ne.s32.totalorder %s29_s16, %s506_s26  ;;  %p512_p5 = scmp.lt.s32.totalorder %s506_s26, %s506_s26 }
   0xd   :  { %p513_p6 = por %p512_p5, %p511_p4 }
   0xf   :  { %p514_p7 = pnand %p513_p6, %p507_p3 }
  0x11   :  { %517 = shalt.err (!%p514_p7)
}
  0x12   :  { %31 = dma.hbm_to_vmem [thread:$0]  %s709_s1, 128, %s29_s16, [#allocation6]  }
  0x13   :  { %s518_s5 = scalar_lea.hbm %s708_s0, 32 }
  0x14   :  { %p519_p8 = scmp.ne.s32.totalorder %s708_s0, %s518_s5  ;;  %p522_p9 = scmp.lt.u32.totalorder %s518_s5, %s708_s0 }
  0x16   :  { %p524_p10 = pnand %p522_p9, %p519_p8 }
  0x18   :  { %527 = shalt.err (!%p524_p10)
}
  0x19   :  { %s528_s10 = scalar_lea.vmem %s19_s18, 32  ;;  %p533_p12 = scmp.lt.s32.totalorder %s19_s18, %s19_s18 }
  0x1a   :  { %p529_p11 = scmp.ne.s32.totalorder %s19_s18, %s528_s10  ;;  %p534_p13 = scmp.lt.s32.totalorder %s528_s10, %s528_s10 }
  0x1c   :  { %p535_p0 = por %p534_p13, %p533_p12 }
  0x1e   :  { %p536_p1 = pnand %p535_p0, %p529_p11 }
  0x20   :  { %539 = shalt.err (!%p536_p1)
}
  0x21   :  { %21 = dma.hbm_to_vmem [thread:$0]  %s708_s0, 32, %s19_s18, [#allocation3]  }
  0x22   :  { %s592_s12 = smov [#allocation7]   ;;  %s540_s16 = scalar_lea.hbm %s710_s2, 256 }
  0x23   :  { %s37_s13 = sshll.u32 %s592_s12, 4  ;;  %p541_p2 = scmp.ne.s32.totalorder %s710_s2, %s540_s16  ;;  %s38_s13 = int_to_ptr.vmem [resolvable:$true] %s37_s13 }
  0x24   :  { %p544_p3 = scmp.lt.u32.totalorder %s540_s16, %s710_s2 }
  0x26   :  { %p546_p4 = pnand %p544_p3, %p541_p2 }
  0x28   :  { %549 = shalt.err (!%p546_p4)
}
  0x29   :  { %s550_s22 = scalar_lea.vmem %s38_s13, 256  ;;  %p555_p6 = scmp.lt.s32.totalorder %s38_s13, %s38_s13 }
  0x2a   :  { %p551_p5 = scmp.ne.s32.totalorder %s38_s13, %s550_s22  ;;  %p556_p7 = scmp.lt.s32.totalorder %s550_s22, %s550_s22 }
  0x2c   :  { %p557_p8 = por %p556_p7, %p555_p6 }
  0x2e   :  { %p558_p9 = pnand %p557_p8, %p551_p5 }
  0x30   :  { %561 = shalt.err (!%p558_p9)
}
  0x31   :  { %s593_s0 = smov 128   ;;  %s594_s18 = smov 8  }
  0x32   :  { %43 = dma.hbm_to_vmem [thread:$0]  %s710_s2, 256, %s38_s13, [#allocation6], %s593_s0, %s593_s0, %s594_s18  }
  0x33   :  { %584 = dma.done.wait [#allocation3], 32  }
  0x34   :  { %585 = vsyncadd [#allocation3], 4294967264 }
  0x35   :  { %586 = dma.done.wait [#allocation6], 384  }
  0x36   :  { %587 = vsyncadd [#allocation6], 4294966912  ;;  %v595_v0 = vmov 0   ;;  %v596_v1 = vmov 2   ;;  %v670_v2 = vld [vmem:[#allocation5] sm:$0xff]  ;;  %v597_v3 = vmov 1   ;;  %v66_v10 = vlaneseq }
  0x37   :  { %479 = vset.pattern.permute.xlu0 %v595_v0  ;;  %481 = vset.pattern.permute.xlu1 %v596_v1  ;;  %v598_v4 = vmov 3   ;;  %v599_v5 = vmov 4   ;;  %v600_v6 = vmov 0.0   ;;  %vm601_vm0 = vmmov 0   ;;  %v55_v14 = vld [vmem:[#allocation2] sm:$0x3] }
  0x38   :  { %63 = vperm.xlu0 %479, %v670_v2   ;;  %82 = vperm.xlu1 %481, %v670_v2   ;;  %v602_v7 = vmov 5   ;;  %v603_v8 = vmov 6   ;;  %v604_v9 = vmov 7   ;;  %v67_v11 = vshrl.u32 %v66_v10, 7  ;;  %v57_v51 = vld [vmem:[#allocation7] sm:$0xff] }
  0x39   :  { %445 = vmatprep.subr.mxu0 %v600_v6  ;;  %450 = vmatprep.subr.mxu1 %v600_v6  ;;  %vm123_vm1 = vcmask 64512   ;;  %v605_v52 = vmov 8   ;;  %v606_v53 = vmov 9   ;;  %v689_v54 = vld [vmem:[%s711_s3] sm:$0xf]  ;;  %v607_v55 = vmov 10  }
  0x3a   :  { %447 = vmatprep.mubr.msk.f32.mxu0 %vm601_vm0, %v600_v6  ;;  %452 = vmatprep.mubr.msk.f32.mxu1 %vm601_vm0, %v600_v6  ;;  %v68_v12 = vsub.s32 0, %v67_v11  ;;  %v77_v13 = vsub.s32 1, %v67_v11  ;;  %s608_s3 = smov [#allocation8]  }
  0x3b   :  { %s426_s26 = sshll.u32 %s608_s3, 4  ;;  %s427_s26 = int_to_ptr.vmem [resolvable:$true] %s426_s26 }
  0x3c   :  { %480 = vset.pattern.permute.xlu0 %v597_v3  ;;  %482 = vset.pattern.permute.xlu1 %v598_v4  ;;  %v69_v16 = vrot.slane %v55_v14, %v68_v12  ;;  %v78_v17 = vrot.slane %v55_v14, %v77_v13  ;;  %s562_s27 = scalar_lea.vmem %s427_s26, 64  ;;  %p567_p11 = scmp.lt.s32.totalorder %s427_s26, %s427_s26 }
  0x3d   :  { %72 = vperm.xlu0 %480, %v670_v2   ;;  %108 = vperm.xlu1 %482, %v670_v2   ;;  %p563_p10 = scmp.ne.s32.totalorder %s427_s26, %s562_s27  ;;  %p568_p12 = scmp.lt.s32.totalorder %s562_s27, %s562_s27 }
  0x3f   :  { %p569_p13 = por %p568_p12, %p567_p11 }
  0x41   :  { %483 = vset.pattern.permute.xlu1 %v599_v5  ;;  %484 = vset.pattern.permute.xlu0 %v602_v7  ;;  %p570_p0 = pnand %p569_p13, %p563_p10 }
  0x42   :  { %114 = vperm.xlu1 %483, %v670_v2   ;;  %120 = vperm.xlu0 %484, %v670_v2  }
  0x46   :  { %485 = vset.pattern.permute.xlu1 %v603_v8  ;;  %487 = vset.pattern.permute.xlu0 %v605_v52 }
  0x47   :  { %220 = vperm.xlu1 %485, %v670_v2   ;;  %232 = vperm.xlu0 %487, %v670_v2  }
  0x4b   :  { %486 = vset.pattern.permute.xlu1 %v604_v9  ;;  %344 = vperm.xlu0 %487, %v689_v54  }
  0x4c   :  { %226 = vperm.xlu1 %486, %v670_v2  }
  0x50   :  { %488 = vset.pattern.permute.xlu1 %v606_v53 }
  0x51   :  { %331 = vperm.xlu1 %488, %v670_v2  }
  0x55   :  { %489 = vset.pattern.permute.xlu1 %v607_v55 }
  0x56   :  { %337 = vperm.xlu1 %489, %v670_v2  }
  0xb7   :  { %v64_v15 = vpop.permute.xlu0 %63  ;;  %v83_v21 = vpop.permute.xlu1 %82 }
  0xb8   :  { %v70_v19 = vmul.f32 %v69_v16, %v64_v15 }
  0xbc   :  { %v73_v18 = vpop.permute.xlu0 %72  ;;  %v109_v43 = vpop.permute.xlu1 %108 }
  0xbd   :  { %v79_v20 = vmul.f32 %v78_v17, %v73_v18 }
  0xbf   :  { %v80_v22 = vadd.f32 %v79_v20, %v70_v19 }
  0xc1   :  { %v85_v23 = vadd.f32 %v83_v21, %v80_v22  ;;  %v115_v47 = vpop.permute.xlu1 %114  ;;  %v121_v56 = vpop.permute.xlu0 %120 }
  0xc3   :  { %v86_v24 = vrot.slane %v85_v23, 4  ;;  %v92_v25 = vmul.f32 %v85_v23, %v85_v23 }
  0xc5   :  { %v87_v26 = vadd.f32 %v86_v24, %v85_v23  ;;  %v93_v27 = vrot.slane %v92_v25, 4  ;;  %v59_v24 = vld [vmem:[#allocation7 + $0x8] sm:$0xff] }
  0xc6   :  { %v221_v16 = vpop.permute.xlu1 %220 }
  0xc7   :  { %v88_v28 = vrot.slane %v87_v26, 2  ;;  %v94_v29 = vadd.f32 %v93_v27, %v92_v25  ;;  %v233_v25 = vpop.permute.xlu0 %232 }
  0xc9   :  { %v89_v30 = vadd.f32 %v88_v28, %v87_v26  ;;  %v95_v31 = vrot.slane %v94_v29, 2 }
  0xcb   :  { %v90_v32 = vrot.slane %v89_v30, 1  ;;  %v96_v33 = vadd.f32 %v95_v31, %v94_v29  ;;  %v227_v20 = vpop.permute.xlu1 %226 }
  0xcd   :  { %v91_v34 = vadd.f32 %v90_v32, %v89_v30  ;;  %v97_v35 = vrot.slane %v96_v33, 1 }
  0xcf   :  { %v98_v36 = vadd.f32 %v97_v35, %v96_v33  ;;  %v99_v37 = vmul.f32 0.125, %v91_v34 }
  0xd1   :  { %v100_v38 = vmul.f32 0.125, %v98_v36  ;;  %v101_v39 = vmul.f32 %v99_v37, %v99_v37  ;;  %v106_v46 = vsub.f32 %v85_v23, %v99_v37 }
  0xd3   :  { %v102_v40 = vsub.f32 %v100_v38, %v101_v39 }
  0xd5   :  { %v103_v41 = vmax.f32 %v102_v40, 0.0 }
  0xd7   :  { %v104_v42 = vadd.f32 1e-05, %v103_v41 }
  0xd9   :  { %490 = vrsqrt.f32 %v104_v42 }
  0xe3   :  { %v491_v44 = vpop.eup %490 }
  0xe4   :  { %v111_v45 = vmul.f32 %v491_v44, %v109_v43 }
  0xe6   :  { %v112_v48 = vmul.f32 %v111_v45, %v106_v46 }
  0xe8   :  { %v117_v49 = vadd.f32 %v115_v47, %v112_v48 }
  0xea   :  { %v118_v50 = vmax.f32 %v117_v49, 0.0  ;;  %v332_v49 = vpop.permute.xlu1 %331 }
  0xec   :  { %446 = vmatpush3.msra.mxu0 %v118_v50 }
  0xed   :  { %448 = vmatmul.mubr.msk.f32.vlgmr.msra.gmra.mrb[0].mxu0 %vm123_vm1, %v57_v51  ;;  %455 = vmatprep.subr.mxu0 %v600_v6 }
  0xee   :  { %457 = vmatprep.mubr.msk.f32.mxu0 %vm601_vm0, %v600_v6  ;;  %v338_v53 = vpop.permute.xlu1 %337 }
 0x1c0   :  { %v193_v57 = vpop.f32.mrb[0].mxu0 }
 0x1c1   :  { %v194_v58 = vadd.f32 %v193_v57, %v121_v56  ;;  %v449_v59 = vpop.f32.mrb[1].mxu0 }
 0x1c3   :  { %v197_v60 = vadd.f32 %v194_v58, %v85_v23  ;;  %v345_v58 = vpop.permute.xlu0 %344 }
 0x1c5   :  { %v198_v61 = vrot.slane %v197_v60, 4  ;;  %v204_v62 = vmul.f32 %v197_v60, %v197_v60 }
 0x1c7   :  { %v199_v63 = vadd.f32 %v198_v61, %v197_v60  ;;  %v205_v0 = vrot.slane %v204_v62, 4 }
 0x1c9   :  { %v200_v1 = vrot.slane %v199_v63, 2  ;;  %v206_v3 = vadd.f32 %v205_v0, %v204_v62 }
 0x1cb   :  { %v201_v4 = vadd.f32 %v200_v1, %v199_v63  ;;  %v207_v5 = vrot.slane %v206_v3, 2 }
 0x1cd   :  { %v202_v6 = vrot.slane %v201_v4, 1  ;;  %v208_v7 = vadd.f32 %v207_v5, %v206_v3 }
 0x1cf   :  { %v203_v8 = vadd.f32 %v202_v6, %v201_v4  ;;  %v209_v9 = vrot.slane %v208_v7, 1 }
 0x1d1   :  { %v210_v10 = vadd.f32 %v209_v9, %v208_v7  ;;  %v211_v11 = vmul.f32 0.125, %v203_v8 }
 0x1d3   :  { %v212_v2 = vmul.f32 0.125, %v210_v10  ;;  %v213_v12 = vmul.f32 %v211_v11, %v211_v11  ;;  %v218_v19 = vsub.f32 %v197_v60, %v211_v11 }
 0x1d5   :  { %v214_v13 = vsub.f32 %v212_v2, %v213_v12 }
 0x1d7   :  { %v215_v14 = vmax.f32 %v214_v13, 0.0 }
 0x1d9   :  { %v216_v15 = vadd.f32 1e-05, %v215_v14 }
 0x1db   :  { %492 = vrsqrt.f32 %v216_v15 }
 0x1e5   :  { %v493_v17 = vpop.eup %492 }
 0x1e6   :  { %v223_v18 = vmul.f32 %v493_v17, %v221_v16 }
 0x1e8   :  { %v224_v21 = vmul.f32 %v223_v18, %v218_v19 }
 0x1ea   :  { %v229_v22 = vadd.f32 %v227_v20, %v224_v21 }
 0x1ec   :  { %v230_v23 = vmax.f32 %v229_v22, 0.0 }
 0x1ee   :  { %451 = vmatpush3.msra.mxu1 %v230_v23 }
 0x1ef   :  { %453 = vmatmul.mubr.msk.f32.vlgmr.msra.gmra.mrb[0].mxu1 %vm123_vm1, %v59_v24 }
 0x2c2   :  { %v304_v26 = vpop.f32.mrb[0].mxu1 }
 0x2c3   :  { %v305_v27 = vadd.f32 %v304_v26, %v233_v25  ;;  %v454_v28 = vpop.f32.mrb[1].mxu1 }
 0x2c5   :  { %v308_v29 = vadd.f32 %v305_v27, %v197_v60 }
 0x2c7   :  { %v309_v30 = vrot.slane %v308_v29, 4  ;;  %v315_v31 = vmul.f32 %v308_v29, %v308_v29 }
 0x2c9   :  { %v310_v32 = vadd.f32 %v309_v30, %v308_v29  ;;  %v316_v33 = vrot.slane %v315_v31, 4 }
 0x2cb   :  { %v311_v34 = vrot.slane %v310_v32, 2  ;;  %v317_v35 = vadd.f32 %v316_v33, %v315_v31 }
 0x2cd   :  { %v312_v36 = vadd.f32 %v311_v34, %v310_v32  ;;  %v318_v37 = vrot.slane %v317_v35, 2 }
 0x2cf   :  { %v313_v38 = vrot.slane %v312_v36, 1  ;;  %v319_v39 = vadd.f32 %v318_v37, %v317_v35 }
 0x2d1   :  { %v314_v40 = vadd.f32 %v313_v38, %v312_v36  ;;  %v320_v41 = vrot.slane %v319_v39, 1 }
 0x2d3   :  { %v322_v42 = vmul.f32 0.125, %v314_v40  ;;  %v321_v43 = vadd.f32 %v320_v41, %v319_v39 }
 0x2d5   :  { %v323_v44 = vmul.f32 0.125, %v321_v43  ;;  %v324_v45 = vmul.f32 %v322_v42, %v322_v42  ;;  %v329_v52 = vsub.f32 %v308_v29, %v322_v42 }
 0x2d7   :  { %v325_v46 = vsub.f32 %v323_v44, %v324_v45 }
 0x2d9   :  { %v326_v47 = vmax.f32 %v325_v46, 0.0 }
 0x2db   :  { %v327_v48 = vadd.f32 1e-05, %v326_v47 }
 0x2dd   :  { %494 = vrsqrt.f32 %v327_v48 }
 0x2e7   :  { %v495_v50 = vpop.eup %494 }
 0x2e8   :  { %v334_v51 = vmul.f32 %v495_v50, %v332_v49 }
 0x2ea   :  { %v335_v55 = vmul.f32 %v334_v51, %v329_v52 }
 0x2ec   :  { %v340_v56 = vadd.f32 %v338_v53, %v335_v55 }
 0x2ee   :  { %v341_v57 = vmax.f32 %v340_v56, 0.0 }
 0x2f0   :  { %456 = vmatpush3.msra.mxu0 %v341_v57 }
 0x2f1   :  { %458 = vmatmul.mubr.msk.f32.vlgmr.msra.gmra.mrb[2].mxu0 %vm123_vm1, %v689_v54 }
 0x3c4   :  { %v415_v59 = vpop.f32.mrb[2].mxu0 }
 0x3c5   :  { %v416_v60 = vadd.f32 %v415_v59, %v345_v58  ;;  %v459_v61 = vpop.f32.mrb[3].mxu0 }
 0x3c7   :  { %419 = vst [vmem:[#allocation8] sm:$0xf] %v416_v60 }
 0x3c8   :  { %573 = shalt.err (!%p570_p0)
}
 0x3c9   :  { %s574_s30 = scalar_lea.hbm %s712_s4, 64 }
 0x3ca   :  { %p575_p1 = scmp.ne.s32.totalorder %s712_s4, %s574_s30  ;;  %p578_p2 = scmp.lt.u32.totalorder %s574_s30, %s712_s4 }
 0x3cc   :  { %p580_p3 = pnand %p578_p2, %p575_p1 }
 0x3ce   :  { %583 = shalt.err (!%p580_p3)
}
 0x3cf   :  { %429 = dma.vmem_to_hbm [thread:$0]  %s427_s26, 64, %s712_s4, [#allocation4]  }
 0x3d0   :  { %588 = dma.done.wait [#allocation4], 64  }
 0x3d1   :  { %589 = vsyncadd [#allocation4], 4294967232 }
 0x3d2   :  { %433 = vsyncpa [#allocation3], 1 }
 0x3d3   :  { %434 = vsyncpa [#allocation6], 1 }
 0x3d4   :  { %435 = vsyncpa [#allocation4], 1 }

</bundles_post_ra>
